<compile_context>
chip_gen: v6e
topology: v6e:2x2x1
jax: 0.10.0
libtpu: 0.0.40
codegen_flags: <defaults>
</compile_context>

<pallas_src>
import functools

import jax
import jax.numpy as jnp
from jax.experimental import pallas as pl
from jax.experimental.pallas import tpu as pltpu


def _round_up(a, m):
    return ((a + m - 1) // m) * m


def _cdiv(a, b):
    return (a + b - 1) // b


def _simam_kernel(x_ref, o_ref, *, inv_hw, inv_n, e_lambda):
    # x_ref: (row_block, HW_padded) tile; rows are independent (b, c) channels.
    x = x_ref[...].astype(jnp.float32)

    # Fused single-pass reductions: sum(x) and sum(x*x) have no serial
    # dependency, and zero lane-padding contributes nothing to either.
    sx = jnp.sum(x, axis=-1, keepdims=True)
    sxx = jnp.sum(x * x, axis=-1, keepdims=True)

    mu = sx * inv_hw                              # per-channel spatial mean
    s = jnp.maximum(sxx - sx * mu, 0.0)           # sum((x - mu)^2), rounding-guarded
    d = x - mu
    d = d * d                                     # (x - mu)^2

    denom = 4.0 * (s * inv_n + e_lambda)          # (row_block, 1)
    inv = pl.reciprocal(denom, approx=True)       # EUP slot; nearly free
    inv = inv * (2.0 - denom * inv)               # one Newton step -> ~f32 accuracy

    y = d * inv + 0.5
    o_ref[...] = (x * jax.nn.sigmoid(y)).astype(o_ref.dtype)


def simam(x, e_lambda=1e-4):
    """SimAM forward pass. x is NCHW, returns same shape/dtype."""
    b, c, h, w = x.shape
    hw = h * w
    n = hw - 1
    rows = b * c
    x2d = x.reshape(rows, hw)

    # Lane-dense spatial axis: pad H*W up to a multiple of 128 (exact thanks to
    # the fused sum / sum-of-squares formulation above).
    hw_p = _round_up(hw, 128)
    itemsize = jnp.dtype(x.dtype).itemsize

    # Tile sizing: memory-bound streaming op, so pick the largest row tile that
    # keeps the double-buffered (in + out) pipeline + in-kernel f32 temporaries
    # comfortably inside VMEM on every generation (incl. v7x's 64 MiB).
    target_tile_bytes = 4 * 1024 * 1024
    row_block = max(8, (target_tile_bytes // (hw_p * itemsize)) // 8 * 8)
    rows_min = _round_up(rows, 8)
    row_block = min(row_block, rows_min)
    # Keep at least 2 grid steps when there is enough work so both v7x
    # TensorCores get fed ("parallel" grid axis); no-op on v5e/v6e.
    if rows_min >= 16 and _cdiv(rows_min, row_block) < 2:
        row_block = max(8, _round_up(_cdiv(rows_min, 2), 8))
    rows_p = _round_up(rows, row_block)

    if (rows_p, hw_p) != (rows, hw):
        # Zero padding: padded rows/lanes compute harmless values and are
        # sliced off below.
        x2d = jnp.pad(x2d, ((0, rows_p - rows), (0, hw_p - hw)))

    kernel = functools.partial(
        _simam_kernel,
        inv_hw=1.0 / float(hw),
        inv_n=1.0 / float(max(n, 1)),
        e_lambda=float(e_lambda),
    )

    out2d = pl.pallas_call(
        kernel,
        out_shape=jax.ShapeDtypeStruct((rows_p, hw_p), x.dtype),
        grid_spec=pltpu.PrefetchScalarGridSpec(
            num_scalar_prefetch=0,
            grid=(rows_p // row_block,),
            in_specs=[pl.BlockSpec((row_block, hw_p), lambda i: (i, 0))],
            out_specs=pl.BlockSpec((row_block, hw_p), lambda i: (i, 0)),
        ),
        compiler_params=pltpu.CompilerParams(
            dimension_semantics=("parallel",),
            vmem_limit_bytes=64 * 1024 * 1024,
        ),
    )(x2d)

    out2d = out2d[:rows, :hw]
    return out2d.reshape(b, c, h, w)


def simam_reference(x, e_lambda=1e-4):
    b, c, h, w = x.shape
    n = w * h - 1
    mu = jnp.mean(x, axis=(2, 3), keepdims=True)
    d = (x - mu) ** 2
    s = jnp.sum(d, axis=(2, 3), keepdims=True)
    y = d / (4.0 * (s / n + e_lambda)) + 0.5
    return x * jax.nn.sigmoid(y)


if __name__ == "__main__":
    key = jax.random.PRNGKey(0)

    # Main test shape (aligned H*W, multiple of 128 lanes).
    B, C, H, W = 2, 4, 16, 16
    x = jax.random.normal(key, (B, C, H, W), dtype=jnp.float32)
    out = jax.block_until_ready(simam(x))
    ref = simam_reference(x)
    assert out.shape == (B, C, H, W)
    assert jnp.allclose(out, ref, atol=1e-4, rtol=1e-4), "mismatch vs reference"

    # Unaligned shape exercises the row / lane padding path.
    x2 = jax.random.normal(jax.random.PRNGKey(1), (2, 3, 7, 7), dtype=jnp.float32)
    out2 = jax.block_until_ready(simam(x2))
    ref2 = simam_reference(x2)
    assert out2.shape == (2, 3, 7, 7)
    assert jnp.allclose(out2, ref2, atol=1e-4, rtol=1e-4), "mismatch (padded path)"

    print("KERNEL_OK")
</pallas_src>

<mosaic_0001>
module attributes {stable_mosaic.version = 11 : i64} {
  func.func @_simam_kernel(%arg0: i32, %arg1: memref<8x256xf32, #tpu.memory_space<vmem>>, %arg2: memref<8x256xf32, #tpu.memory_space<vmem>>) attributes {dimension_semantics = [#tpu.dimension_semantics<parallel>], iteration_bounds = array<i64: 1>, scalar_prefetch = 0 : i64, scratch_operands = 0 : i64, tpu.core_type = #tpu.core_type<tc>, window_params = [{transform_indices = @transform_0, window_bounds = array<i64: 8, 256>}, {transform_indices = @transform_1, window_bounds = array<i64: 8, 256>}]} {
    %c0 = arith.constant 0 : index
    %c0_0 = arith.constant 0 : index
    %0 = vector.load %arg1[%c0, %c0_0] : memref<8x256xf32, #tpu.memory_space<vmem>>, vector<8x256xf32>
    %cst = arith.constant dense<0.000000e+00> : vector<8xf32>
    %1 = vector.multi_reduction <add>, %0, %cst [1] : vector<8x256xf32> to vector<8xf32>
    %2 = vector.shape_cast %1 : vector<8xf32> to vector<8x1xf32>
    %3 = arith.mulf %0, %0 : vector<8x256xf32>
    %cst_1 = arith.constant dense<0.000000e+00> : vector<8xf32>
    %4 = vector.multi_reduction <add>, %3, %cst_1 [1] : vector<8x256xf32> to vector<8xf32>
    %5 = vector.shape_cast %4 : vector<8xf32> to vector<8x1xf32>
    %cst_2 = arith.constant 3.906250e-03 : f32
    %6 = vector.broadcast %cst_2 : f32 to vector<8x1xf32>
    %7 = arith.mulf %2, %6 : vector<8x1xf32>
    %8 = arith.mulf %2, %7 : vector<8x1xf32>
    %9 = arith.subf %5, %8 : vector<8x1xf32>
    %cst_3 = arith.constant 0.000000e+00 : f32
    %10 = vector.broadcast %cst_3 : f32 to vector<8x1xf32>
    %11 = arith.maximumf %9, %10 : vector<8x1xf32>
    %12 = vector.broadcast %7 : vector<8x1xf32> to vector<8x256xf32>
    %13 = arith.subf %0, %12 : vector<8x256xf32>
    %14 = arith.mulf %13, %13 : vector<8x256xf32>
    %cst_4 = arith.constant 0.00392156886 : f32
    %15 = vector.broadcast %cst_4 : f32 to vector<8x1xf32>
    %16 = arith.mulf %11, %15 : vector<8x1xf32>
    %cst_5 = arith.constant 9.99999974E-5 : f32
    %17 = vector.broadcast %cst_5 : f32 to vector<8x1xf32>
    %18 = arith.addf %16, %17 : vector<8x1xf32>
    %cst_6 = arith.constant 4.000000e+00 : f32
    %19 = vector.broadcast %cst_6 : f32 to vector<8x1xf32>
    %20 = arith.mulf %19, %18 : vector<8x1xf32>
    %21 = tpu.reciprocal %20 {approx = true} : vector<8x1xf32> -> vector<8x1xf32>
    %22 = arith.mulf %20, %21 : vector<8x1xf32>
    %cst_7 = arith.constant 2.000000e+00 : f32
    %23 = vector.broadcast %cst_7 : f32 to vector<8x1xf32>
    %24 = arith.subf %23, %22 : vector<8x1xf32>
    %25 = arith.mulf %21, %24 : vector<8x1xf32>
    %26 = vector.broadcast %25 : vector<8x1xf32> to vector<8x256xf32>
    %27 = arith.mulf %14, %26 : vector<8x256xf32>
    %cst_8 = arith.constant 5.000000e-01 : f32
    %28 = vector.broadcast %cst_8 : f32 to vector<8x256xf32>
    %29 = arith.addf %27, %28 : vector<8x256xf32>
    %30 = arith.negf %29 : vector<8x256xf32>
    %31 = math.exp %30 : vector<8x256xf32>
    %cst_9 = arith.constant 1.000000e+00 : f32
    %32 = vector.broadcast %cst_9 : f32 to vector<8x256xf32>
    %33 = arith.addf %32, %31 : vector<8x256xf32>
    %34 = arith.divf %32, %33 : vector<8x256xf32>
    %35 = arith.mulf %0, %34 : vector<8x256xf32>
    %c0_10 = arith.constant 0 : index
    %c0_11 = arith.constant 0 : index
    %36 = vector.load %arg2[%c0_10, %c0_11] : memref<8x256xf32, #tpu.memory_space<vmem>>, vector<8x256xf32>
    tpu.vector_store %arg2[%c0_10, %c0_11], %35 {strides = array<i32>} : memref<8x256xf32, #tpu.memory_space<vmem>>, vector<8x256xf32>,
    return
  }
  func.func @transform_0(%arg0: i32) -> (i32, i32) {
    %c0_i32 = arith.constant 0 : i32
    %c0_i32_0 = arith.constant 0 : i32
    return %arg0, %c0_i32 : i32, i32
  }
  func.func @transform_1(%arg0: i32) -> (i32, i32) {
    %c0_i32 = arith.constant 0 : i32
    %c0_i32_0 = arith.constant 0 : i32
    return %arg0, %c0_i32 : i32, i32
  }
}

</mosaic_0001>

<bundles_post_ra>
// kernel: tpu_custom_call.1
= control target key start
LH: loop header
LB: loop body
LE: loop exit
PB: predicated region body
PF: predicated region fallthrough
CT: control target
= control target key end

     0   :  { %6 = vsyncpa [#allocation3], 0  ;;  %s157_s0 = inlined_call_operand.hbm [shape: f32[8,256], index: 0, kind: input, shape index: {}]   ;;  %s158_s1 = inlined_call_operand.hbm [shape: f32[8,256], index: 1, kind: output, shape index: {}]  }
   0x1   :  { %7 = vsyncpa [#allocation4], 0  ;;  %s139_s6 = smov [#allocation2]  }
   0x2   :  { %s14_s7 = sshll.u32 %s139_s6, 4  ;;  %s15_s7 = int_to_ptr.vmem [resolvable:$true] %s14_s7 }
   0x3   :  { %s103_s8 = scalar_lea.vmem %s15_s7, 256  ;;  %p108_p1 = scmp.lt.s32.totalorder %s15_s7, %s15_s7 }
   0x4   :  { %p104_p0 = scmp.ne.s32.totalorder %s15_s7, %s103_s8  ;;  %p109_p2 = scmp.lt.s32.totalorder %s103_s8, %s103_s8 }
   0x6   :  { %p110_p3 = por %p109_p2, %p108_p1 }
   0x8   :  { %p111_p4 = pnand %p110_p3, %p104_p0 }
   0xa   :  { %114 = shalt.err (!%p111_p4)
}
   0xb   :  { %17 = dma.hbm_to_vmem [thread:$0]  %s157_s0, 256, %s15_s7, [#allocation3]  }
   0xc   :  { %135 = dma.done.wait [#allocation3], 256  }
   0xd   :  { %136 = vsyncadd [#allocation3], 4294967040  ;;  %v21_v0 = vld [vmem:[#allocation2] sm:$0xff]  ;;  %v22_v1 = vld [vmem:[#allocation2 + $0x8] sm:$0xff]  ;;  %s140_s0 = smov [#allocation5]  }
   0xe   :  { %v23_v2 = vadd.f32 %v22_v1, %v21_v0  ;;  %v26_v3 = vmul.f32 %v21_v0, %v21_v0  ;;  %v27_v4 = vmul.f32 %v22_v1, %v22_v1  ;;  %s72_s11 = sshll.u32 %s140_s0, 4  ;;  %s73_s11 = int_to_ptr.vmem [resolvable:$true] %s72_s11 }
   0xf   :  { %s115_s12 = scalar_lea.vmem %s73_s11, 256  ;;  %p120_p6 = scmp.lt.s32.totalorder %s73_s11, %s73_s11 }
  0x10   :  { %24 = vadd.xlane.f32.xlu0 %v23_v2  ;;  %v28_v5 = vadd.f32 %v27_v4, %v26_v3  ;;  %p116_p5 = scmp.ne.s32.totalorder %s73_s11, %s115_s12  ;;  %p121_p7 = scmp.lt.s32.totalorder %s115_s12, %s115_s12 }
  0x12   :  { %p122_p8 = por %p121_p7, %p120_p6 }
  0x14   :  { %29 = vadd.xlane.f32.xlu0 %v28_v5  ;;  %p123_p9 = pnand %p122_p8, %p116_p5 }
  0x99   :  { %v25_v6 = vpop.xlane.xlu0 %24 }
  0x9a   :  { %v31_v7 = vmul.f32 0.00390625, %v25_v6 }
  0x9c   :  { %v32_v8 = vmul.f32 %v31_v7, %v25_v6  ;;  %v35_v16 = vsub.f32 %v21_v0, %v31_v7  ;;  %v36_v17 = vsub.f32 %v22_v1, %v31_v7 }
  0x9d   :  { %v30_v9 = vpop.xlane.xlu0 %29 }
  0x9e   :  { %v33_v10 = vsub.f32 %v30_v9, %v32_v8  ;;  %v37_v20 = vmul.f32 %v35_v16, %v35_v16  ;;  %v38_v21 = vmul.f32 %v36_v17, %v36_v17 }
  0xa0   :  { %v34_v11 = vmax.f32 %v33_v10, 0.0 }
  0xa2   :  { %v39_v12 = vmul.f32 0.003921569, %v34_v11 }
  0xa4   :  { %v40_v13 = vadd.f32 0.0001, %v39_v12 }
  0xa6   :  { %v41_v14 = vmul.f32 4.0, %v40_v13 }
  0xa8   :  { %85 = vrcp.f32 %v41_v14 }
  0xb5   :  { %v86_v15 = vpop.eup %85 }
  0xb6   :  { %v43_v18 = vmul.f32 %v86_v15, %v41_v14 }
  0xb8   :  { %v44_v19 = vsub.f32 2.0, %v43_v18 }
  0xba   :  { %v45_v22 = vmul.f32 %v86_v15, %v44_v19 }
  0xbc   :  { %v46_v23 = vmul.f32 %v45_v22, %v37_v20  ;;  %v47_v24 = vmul.f32 %v45_v22, %v38_v21 }
  0xbe   :  { %v48_v25 = vadd.f32 0.5, %v46_v23  ;;  %v49_v26 = vadd.f32 0.5, %v47_v24 }
  0xc0   :  { %v81_v27 = vmul.f32 -1.442695, %v48_v25  ;;  %v82_v28 = vmul.f32 -1.442695, %v49_v26 }
  0xc2   :  { %87 = vpow2.f32 %v81_v27 }
  0xc3   :  { %89 = vpow2.f32 %v82_v28 }
  0xcf   :  { %v88_v29 = vpop.eup %87 }
  0xd0   :  { %v90_v30 = vpop.eup %89  ;;  %v56_v31 = vadd.f32 1.0, %v88_v29 }
  0xd1   :  { %v57_v32 = vadd.f32 1.0, %v90_v30 }
  0xd2   :  { %91 = vrcp.f32 %v56_v31 }
  0xd3   :  { %93 = vrcp.f32 %v57_v32 }
  0xdf   :  { %v92_v33 = vpop.eup %91 }
  0xe0   :  { %v94_v34 = vpop.eup %93  ;;  %v62_v35 = vmul.f32 %v92_v33, %v21_v0 }
  0xe1   :  { %v63_v36 = vmul.f32 %v94_v34, %v22_v1 }
  0xe2   :  { %64 = vst [vmem:[#allocation5] sm:$0xff] %v62_v35 }
  0xe3   :  { %65 = vst [vmem:[#allocation5 + $0x8] sm:$0xff] %v63_v36 }
  0xe4   :  { %126 = shalt.err (!%p123_p9)
}
  0xe5   :  { %75 = dma.vmem_to_hbm [thread:$0]  %s73_s11, 256, %s158_s1, [#allocation4]  }
  0xe6   :  { %137 = dma.done.wait [#allocation4], 256  }
  0xe7   :  { %138 = vsyncadd [#allocation4], 4294967040 }
  0xe8   :  { %79 = vsyncpa [#allocation3], 1 }
  0xe9   :  { %80 = vsyncpa [#allocation4], 1 }

</bundles_post_ra>
